<compile_context>
chip_gen: v6e
topology: v6e:2x2x1
jax: 0.10.0
libtpu: 0.0.40
codegen_flags: <defaults>
</compile_context>

<pallas_src>
import jax
import jax.numpy as jnp
from jax.experimental import pallas as pl
from jax.experimental.pallas import tpu as pltpu

LN_EPS = 1e-5  # PyTorch nn.LayerNorm default


def dipole_kernel(consts_ref, s_ref, r_ones_ref, r_wg_ref, mask_ref, pos_ref, out_ref):
    # consts (SMEM): [beta . w, sum(gamma * w)]
    b0 = consts_ref[0]
    wg_sum = consts_ref[1]

    s = s_ref[...]                       # (tb, N*H) bf16, lane-dense
    r_ones = r_ones_ref[...]             # (N*H, N)  bf16 block-diag ones (exact)
    r_wg = r_wg_ref[...]                 # (N*H, N)  bf16 block-diag gamma*w
    m = mask_ref[...].astype(jnp.float32)  # (tb, N)  1.0 = real atom, 0.0 = pad

    n = pos_ref.shape[-1]
    h = s.shape[-1] // n
    inv_h = 1.0 / float(h)

    # --- fused LayerNorm + Linear(H -> 1, bias=False) via MXU reductions -----
    # bf16 inputs, f32 accumulation; trivially small FLOPs but lane-dense and
    # off the XLU/VPU critical path.
    s_sum = jnp.dot(s, r_ones, preferred_element_type=jnp.float32)      # (tb, N)
    s_wg = jnp.dot(s, r_wg, preferred_element_type=jnp.float32)         # (tb, N)
    s_sq = jnp.dot(s * s, r_ones, preferred_element_type=jnp.float32)   # (tb, N)

    mean = s_sum * inv_h
    var = jnp.maximum(s_sq * inv_h - mean * mean, 0.0)
    inv_std = jax.lax.rsqrt(var + LN_EPS)
    q = inv_std * (s_wg - mean * wg_sum) + b0                           # (tb, N)

    # --- mask padding atoms, subtract per-molecule mean charge ---------------
    q = q * m
    cnt = jnp.sum(m, axis=-1, keepdims=True)                            # (tb, 1)
    qsum = jnp.sum(q, axis=-1, keepdims=True)                           # (tb, 1)
    q = (q - qsum / jnp.maximum(cnt, 1.0)) * m                          # exact divide

    # --- dipole vector: three lane-dense reductions over N -------------------
    dx = jnp.sum(q * pos_ref[0], axis=-1, keepdims=True)                # (tb, 1)
    dy = jnp.sum(q * pos_ref[1], axis=-1, keepdims=True)
    dz = jnp.sum(q * pos_ref[2], axis=-1, keepdims=True)
    out_ref[...] = jnp.sqrt(dx * dx + dy * dy + dz * dz)


def _round_up(x, m):
    return ((x + m - 1) // m) * m


def qm9_dipole_moment(z, s, pos, gamma, beta, w, *, block_b=512):
    """Forward of QM9dipole_moment.

    z   : (B, N) int     atomic numbers (0 == padding atom)
    s   : (B, N, H)      per-atom scalar features (kernel consumes them as bf16)
    pos : (B, N, 3)      atom positions
    gamma, beta : (H,) or (1, H)   LayerNorm affine params (ones/zeros if frozen)
    w   : (H, 1)         Linear(H, 1, bias=False) weight
    returns (B, 1) float32 dipole-moment magnitude per molecule.
    """
    B, N, H = s.shape
    assert z.shape == (B, N) and pos.shape == (B, N, 3)

    # ---- algebraic fusion of LN affine + Linear (once, outside the kernel) ----
    w_vec = jnp.asarray(w, jnp.float32).reshape(H)
    gamma_v = jnp.asarray(gamma, jnp.float32).reshape(H)
    beta_v = jnp.asarray(beta, jnp.float32).reshape(H)
    wg = gamma_v * w_vec                                                  # (H,)
    consts = jnp.stack([jnp.sum(beta_v * w_vec), jnp.sum(wg)]).astype(jnp.float32)

    # ---- tiny block-diagonal reduction matrices for the MXU -------------------
    eye_n = jnp.eye(N, dtype=jnp.float32)
    r_ones = jnp.kron(eye_n, jnp.ones((H, 1), jnp.float32)).astype(jnp.bfloat16)  # (N*H, N)
    r_wg = jnp.kron(eye_n, wg.reshape(H, 1)).astype(jnp.bfloat16)                 # (N*H, N)

    # ---- dtype / layout prep ---------------------------------------------------
    s_flat = s.astype(jnp.bfloat16).reshape(B, N * H)                 # lane-dense bf16
    maskf = (z != 0).astype(jnp.bfloat16)                             # (B, N)
    pos_t = jnp.transpose(pos.astype(jnp.float32), (2, 0, 1))         # (3, B, N)

    # ---- batch tile size: >=2 grid steps when possible, VMEM-aware cap --------
    if B <= 8:
        tb = B
    else:
        tb = min(block_b, _round_up(pl.cdiv(B, 2), 8))                # megacore on v7x
        # keep double-buffered s under ~8 MiB (fits v5e's 16 MiB scoped default)
        cap = max(8, ((8 * 1024 * 1024) // (2 * N * H * 2)) // 8 * 8)
        tb = max(8, min(tb, cap))
    n_blocks = pl.cdiv(B, tb)

    out = pl.pallas_call(
        dipole_kernel,
        out_shape=jax.ShapeDtypeStruct((B, 1), jnp.float32),
        grid=(n_blocks,),
        in_specs=[
            pl.BlockSpec(memory_space=pltpu.MemorySpace.SMEM),        # consts (2,)
            pl.BlockSpec((tb, N * H), lambda i: (i, 0)),              # s_flat bf16
            pl.BlockSpec((N * H, N), lambda i: (0, 0)),               # R_ones (resident)
            pl.BlockSpec((N * H, N), lambda i: (0, 0)),               # R_wg   (resident)
            pl.BlockSpec((tb, N), lambda i: (i, 0)),                  # validity mask
            pl.BlockSpec((3, tb, N), lambda i: (0, i, 0)),            # pos^T (3, B, N)
        ],
        out_specs=pl.BlockSpec((tb, 1), lambda i: (i, 0)),
        compiler_params=pltpu.CompilerParams(
            dimension_semantics=("parallel",),
            vmem_limit_bytes=32 * 1024 * 1024,
        ),
    )(consts, s_flat, r_ones, r_wg, maskf, pos_t)
    return out


def reference(z, s, pos, gamma, beta, w):
    """Pure-JAX reference mirroring the PyTorch forward (f32 math)."""
    mask = z == 0
    s = s.astype(jnp.float32)
    mean = jnp.mean(s, axis=-1, keepdims=True)
    var = jnp.mean((s - mean) ** 2, axis=-1, keepdims=True)
    ln = (s - mean) / jnp.sqrt(var + LN_EPS) * gamma.reshape(1, 1, -1) + beta.reshape(1, 1, -1)
    q = jnp.einsum('bnh,ho->bno', ln, w)[..., 0]                      # (B, N)
    q = jnp.where(mask, 0.0, q)
    cnt = jnp.sum(1.0 - mask.astype(jnp.float32), axis=1, keepdims=True)
    q = q - jnp.sum(q, axis=1, keepdims=True) / cnt
    q = jnp.where(mask, 0.0, q)
    d = jnp.sum(q[:, :, None] * pos, axis=1)
    return jnp.linalg.norm(d, axis=-1, keepdims=True)


def _make_inputs(key, B, N, H):
    k_z, k_s, k_pos, k_g, k_b, k_w = jax.random.split(key, 6)
    z = jax.random.randint(k_z, (B, N), 0, 6, dtype=jnp.int32)
    z = z.at[:, 0].set(1)  # guarantee at least one real atom per molecule
    s = jax.random.normal(k_s, (B, N, H), dtype=jnp.float32)
    pos = jax.random.normal(k_pos, (B, N, 3), dtype=jnp.float32)
    gamma = 1.0 + 0.1 * jax.random.normal(k_g, (1, H), dtype=jnp.float32)
    beta = 0.1 * jax.random.normal(k_b, (1, H), dtype=jnp.float32)
    w = jax.random.normal(k_w, (H, 1), dtype=jnp.float32) / jnp.sqrt(H)
    return z, s, pos, gamma, beta, w


if __name__ == "__main__":
    # --- small demo shape: single block -------------------------------------
    z, s, pos, gamma, beta, w = _make_inputs(jax.random.PRNGKey(0), B=2, N=8, H=32)
    out = jax.block_until_ready(qm9_dipole_moment(z, s, pos, gamma, beta, w))
    s_q = s.astype(jnp.bfloat16).astype(jnp.float32)   # kernel consumes bf16 features
    ref = reference(z, s_q, pos, gamma, beta, w)
    assert out.shape == (2, 1), out.shape
    assert jnp.allclose(out, ref, rtol=2e-2, atol=1e-2), (out, ref)

    # --- multi-block + non-divisible batch (exercises boundary handling) ----
    z, s, pos, gamma, beta, w = _make_inputs(jax.random.PRNGKey(1), B=10, N=8, H=32)
    out = jax.block_until_ready(
        qm9_dipole_moment(z, s, pos, gamma, beta, w, block_b=8))
    s_q = s.astype(jnp.bfloat16).astype(jnp.float32)
    ref = reference(z, s_q, pos, gamma, beta, w)
    assert out.shape == (10, 1), out.shape
    assert jnp.allclose(out, ref, rtol=2e-2, atol=1e-2), (out, ref)

    print("KERNEL_OK")
</pallas_src>

<mosaic_0001>
module attributes {stable_mosaic.version = 11 : i64} {
  func.func @dipole_kernel(%arg0: i32, %arg1: memref<2xf32, #tpu.memory_space<smem>>, %arg2: memref<2x256xbf16, #tpu.memory_space<vmem>>, %arg3: memref<256x8xbf16, #tpu.memory_space<vmem>>, %arg4: memref<256x8xbf16, #tpu.memory_space<vmem>>, %arg5: memref<2x8xbf16, #tpu.memory_space<vmem>>, %arg6: memref<3x2x8xf32, #tpu.memory_space<vmem>>, %arg7: memref<2x1xf32, #tpu.memory_space<vmem>>) attributes {dimension_semantics = [#tpu.dimension_semantics<parallel>], iteration_bounds = array<i64: 1>, scalar_prefetch = 0 : i64, scratch_operands = 0 : i64, tpu.core_type = #tpu.core_type<tc>, window_params = [{transform_indices = @transform_0, window_bounds = array<i64: 2>}, {transform_indices = @transform_1, window_bounds = array<i64: 2, 256>}, {pipeline_mode = #tpu.pipeline_mode<synchronous>, transform_indices = @transform_2, window_bounds = array<i64: 256, 8>}, {pipeline_mode = #tpu.pipeline_mode<synchronous>, transform_indices = @transform_3, window_bounds = array<i64: 256, 8>}, {transform_indices = @transform_4, window_bounds = array<i64: 2, 8>}, {transform_indices = @transform_5, window_bounds = array<i64: 3, 2, 8>}, {transform_indices = @transform_6, window_bounds = array<i64: 2, 1>}]} {
    %c0 = arith.constant 0 : index
    %0 = memref.load %arg1[%c0] : memref<2xf32, #tpu.memory_space<smem>>
    %c1 = arith.constant 1 : index
    %1 = memref.load %arg1[%c1] : memref<2xf32, #tpu.memory_space<smem>>
    %c0_0 = arith.constant 0 : index
    %c0_1 = arith.constant 0 : index
    %2 = vector.load %arg2[%c0_0, %c0_1] : memref<2x256xbf16, #tpu.memory_space<vmem>>, vector<2x256xbf16>
    %c0_2 = arith.constant 0 : index
    %c0_3 = arith.constant 0 : index
    %3 = vector.load %arg3[%c0_2, %c0_3] : memref<256x8xbf16, #tpu.memory_space<vmem>>, vector<256x8xbf16>
    %c0_4 = arith.constant 0 : index
    %c0_5 = arith.constant 0 : index
    %4 = vector.load %arg4[%c0_4, %c0_5] : memref<256x8xbf16, #tpu.memory_space<vmem>>, vector<256x8xbf16>
    %c0_6 = arith.constant 0 : index
    %c0_7 = arith.constant 0 : index
    %5 = vector.load %arg5[%c0_6, %c0_7] : memref<2x8xbf16, #tpu.memory_space<vmem>>, vector<2x8xbf16>
    %6 = arith.extf %5 : vector<2x8xbf16> to vector<2x8xf32>
    %cst = arith.constant dense<0.000000e+00> : vector<2x8xf32>
    %7 = tpu.matmul %2, %3, %cst {dimension_numbers = #tpu.dot_dimension_numbers<[1], [0], [0], [1], [0, 0, 1, 1], [], []>} : vector<2x256xbf16>, vector<256x8xbf16>, vector<2x8xf32> -> vector<2x8xf32>
    %cst_8 = arith.constant dense<0.000000e+00> : vector<2x8xf32>
    %8 = tpu.matmul %2, %4, %cst_8 {dimension_numbers = #tpu.dot_dimension_numbers<[1], [0], [0], [1], [0, 0, 1, 1], [], []>} : vector<2x256xbf16>, vector<256x8xbf16>, vector<2x8xf32> -> vector<2x8xf32>
    %9 = arith.mulf %2, %2 : vector<2x256xbf16>
    %cst_9 = arith.constant dense<0.000000e+00> : vector<2x8xf32>
    %10 = tpu.matmul %9, %3, %cst_9 {dimension_numbers = #tpu.dot_dimension_numbers<[1], [0], [0], [1], [0, 0, 1, 1], [], []>} : vector<2x256xbf16>, vector<256x8xbf16>, vector<2x8xf32> -> vector<2x8xf32>
    %cst_10 = arith.constant 3.125000e-02 : f32
    %11 = vector.broadcast %cst_10 : f32 to vector<2x8xf32>
    %12 = arith.mulf %7, %11 : vector<2x8xf32>
    %cst_11 = arith.constant 3.125000e-02 : f32
    %13 = vector.broadcast %cst_11 : f32 to vector<2x8xf32>
    %14 = arith.mulf %10, %13 : vector<2x8xf32>
    %15 = arith.mulf %12, %12 : vector<2x8xf32>
    %16 = arith.subf %14, %15 : vector<2x8xf32>
    %cst_12 = arith.constant 0.000000e+00 : f32
    %17 = vector.broadcast %cst_12 : f32 to vector<2x8xf32>
    %18 = arith.maximumf %16, %17 : vector<2x8xf32>
    %cst_13 = arith.constant 9.99999974E-6 : f32
    %19 = vector.broadcast %cst_13 : f32 to vector<2x8xf32>
    %20 = arith.addf %18, %19 : vector<2x8xf32>
    %21 = math.rsqrt %20 : vector<2x8xf32>
    %22 = vector.broadcast %1 : f32 to vector<2x8xf32>
    %23 = arith.mulf %12, %22 : vector<2x8xf32>
    %24 = arith.subf %8, %23 : vector<2x8xf32>
    %25 = arith.mulf %21, %24 : vector<2x8xf32>
    %26 = vector.broadcast %0 : f32 to vector<2x8xf32>
    %27 = arith.addf %25, %26 : vector<2x8xf32>
    %28 = arith.mulf %27, %6 : vector<2x8xf32>
    %cst_14 = arith.constant dense<0.000000e+00> : vector<2xf32>
    %29 = vector.multi_reduction <add>, %6, %cst_14 [1] : vector<2x8xf32> to vector<2xf32>
    %30 = vector.shape_cast %29 : vector<2xf32> to vector<2x1xf32>
    %cst_15 = arith.constant dense<0.000000e+00> : vector<2xf32>
    %31 = vector.multi_reduction <add>, %28, %cst_15 [1] : vector<2x8xf32> to vector<2xf32>
    %32 = vector.shape_cast %31 : vector<2xf32> to vector<2x1xf32>
    %cst_16 = arith.constant 1.000000e+00 : f32
    %33 = vector.broadcast %cst_16 : f32 to vector<2x1xf32>
    %34 = arith.maximumf %30, %33 : vector<2x1xf32>
    %35 = arith.divf %32, %34 : vector<2x1xf32>
    %36 = vector.broadcast %35 : vector<2x1xf32> to vector<2x8xf32>
    %37 = arith.subf %28, %36 : vector<2x8xf32>
    %38 = arith.mulf %37, %6 : vector<2x8xf32>
    %c0_17 = arith.constant 0 : index
    %c0_18 = arith.constant 0 : index
    %c0_19 = arith.constant 0 : index
    %39 = vector.load %arg6[%c0_17, %c0_18, %c0_19] : memref<3x2x8xf32, #tpu.memory_space<vmem>>, vector<1x2x8xf32>
    %40 = vector.shape_cast %39 : vector<1x2x8xf32> to vector<2x8xf32>
    %41 = arith.mulf %38, %40 : vector<2x8xf32>
    %cst_20 = arith.constant dense<0.000000e+00> : vector<2xf32>
    %42 = vector.multi_reduction <add>, %41, %cst_20 [1] : vector<2x8xf32> to vector<2xf32>
    %43 = vector.shape_cast %42 : vector<2xf32> to vector<2x1xf32>
    %c1_21 = arith.constant 1 : index
    %c0_22 = arith.constant 0 : index
    %c0_23 = arith.constant 0 : index
    %44 = vector.load %arg6[%c1_21, %c0_22, %c0_23] : memref<3x2x8xf32, #tpu.memory_space<vmem>>, vector<1x2x8xf32>
    %45 = vector.shape_cast %44 : vector<1x2x8xf32> to vector<2x8xf32>
    %46 = arith.mulf %38, %45 : vector<2x8xf32>
    %cst_24 = arith.constant dense<0.000000e+00> : vector<2xf32>
    %47 = vector.multi_reduction <add>, %46, %cst_24 [1] : vector<2x8xf32> to vector<2xf32>
    %48 = vector.shape_cast %47 : vector<2xf32> to vector<2x1xf32>
    %c2 = arith.constant 2 : index
    %c0_25 = arith.constant 0 : index
    %c0_26 = arith.constant 0 : index
    %49 = vector.load %arg6[%c2, %c0_25, %c0_26] : memref<3x2x8xf32, #tpu.memory_space<vmem>>, vector<1x2x8xf32>
    %50 = vector.shape_cast %49 : vector<1x2x8xf32> to vector<2x8xf32>
    %51 = arith.mulf %38, %50 : vector<2x8xf32>
    %cst_27 = arith.constant dense<0.000000e+00> : vector<2xf32>
    %52 = vector.multi_reduction <add>, %51, %cst_27 [1] : vector<2x8xf32> to vector<2xf32>
    %53 = vector.shape_cast %52 : vector<2xf32> to vector<2x1xf32>
    %54 = arith.mulf %43, %43 : vector<2x1xf32>
    %55 = arith.mulf %48, %48 : vector<2x1xf32>
    %56 = arith.addf %54, %55 : vector<2x1xf32>
    %57 = arith.mulf %53, %53 : vector<2x1xf32>
    %58 = arith.addf %56, %57 : vector<2x1xf32>
    %59 = math.sqrt %58 : vector<2x1xf32>
    %c0_28 = arith.constant 0 : index
    %c0_29 = arith.constant 0 : index
    %60 = vector.load %arg7[%c0_28, %c0_29] : memref<2x1xf32, #tpu.memory_space<vmem>>, vector<2x1xf32>
    tpu.vector_store %arg7[%c0_28, %c0_29], %59 {strides = array<i32>} : memref<2x1xf32, #tpu.memory_space<vmem>>, vector<2x1xf32>,
    return
  }
  func.func @transform_0(%arg0: i32) -> i32 {
    %c0_i32 = arith.constant 0 : i32
    %c0_i32_0 = arith.constant 0 : i32
    return %c0_i32 : i32
  }
  func.func @transform_1(%arg0: i32) -> (i32, i32) {
    %c0_i32 = arith.constant 0 : i32
    %c0_i32_0 = arith.constant 0 : i32
    return %arg0, %c0_i32 : i32, i32
  }
  func.func @transform_2(%arg0: i32) -> (i32, i32) {
    %c0_i32 = arith.constant 0 : i32
    %c0_i32_0 = arith.constant 0 : i32
    %c0_i32_1 = arith.constant 0 : i32
    return %c0_i32, %c0_i32_0 : i32, i32
  }
  func.func @transform_3(%arg0: i32) -> (i32, i32) {
    %c0_i32 = arith.constant 0 : i32
    %c0_i32_0 = arith.constant 0 : i32
    %c0_i32_1 = arith.constant 0 : i32
    return %c0_i32, %c0_i32_0 : i32, i32
  }
  func.func @transform_4(%arg0: i32) -> (i32, i32) {
    %c0_i32 = arith.constant 0 : i32
    %c0_i32_0 = arith.constant 0 : i32
    return %arg0, %c0_i32 : i32, i32
  }
  func.func @transform_5(%arg0: i32) -> (i32, i32, i32) {
    %c0_i32 = arith.constant 0 : i32
    %c0_i32_0 = arith.constant 0 : i32
    %c0_i32_1 = arith.constant 0 : i32
    return %c0_i32, %arg0, %c0_i32_0 : i32, i32, i32
  }
  func.func @transform_6(%arg0: i32) -> (i32, i32) {
    %c0_i32 = arith.constant 0 : i32
    %c0_i32_0 = arith.constant 0 : i32
    return %arg0, %c0_i32 : i32, i32
  }
}

</mosaic_0001>

<bundles_post_ra>
// kernel: tpu_custom_call.1
= control target key start
LH: loop header
LB: loop body
LE: loop exit
PB: predicated region body
PF: predicated region fallthrough
CT: control target
= control target key end

     0   :  { %11 = vsyncpa [#allocation3], 0  ;;  %s881_s0 = inlined_call_operand.vmem [shape: f32[2], index: 0, kind: input, shape index: {}]   ;;  %s882_s1 = inlined_call_operand.vmem [shape: bf16[2,256], index: 1, kind: input, shape index: {}]   ;;  %s883_s2 = inlined_call_operand.vmem [shape: bf16[256,8], index: 2, kind: input, shape index: {}]   ;;  %s884_s3 = inlined_call_operand.vmem [shape: bf16[256,8], index: 3, kind: input, shape index: {}]   ;;  %s885_s4 = inlined_call_operand.vmem [shape: bf16[2,8], index: 4, kind: input, shape index: {}]   ;;  %s886_s5 = inlined_call_operand.vmem [shape: f32[3,2,8], index: 5, kind: input, shape index: {}]   ;;  %s887_s6 = inlined_call_operand.vmem [shape: f32[2,1], index: 6, kind: output, shape index: {}]  }
   0x1   :  { %s18_s23 = sshll.u32 %s881_s0, 4  ;;  %s19_s23 = int_to_ptr.vmem [resolvable:$true] %s18_s23 }
   0x2   :  { %s672_s24 = scalar_lea.vmem %s19_s23, 16  ;;  %p677_p1 = scmp.lt.s32.totalorder %s19_s23, %s19_s23 }
   0x3   :  { %p673_p0 = scmp.ne.s32.totalorder %s19_s23, %s672_s24  ;;  %p678_p2 = scmp.lt.s32.totalorder %s672_s24, %s672_s24 }
   0x5   :  { %p679_p3 = por %p678_p2, %p677_p1 }
   0x7   :  { %p680_p4 = pnand %p679_p3, %p673_p0 }
   0x9   :  { %683 = shalt.err (!%p680_p4)
}
   0xa   :  { %s686_s25 = smov [#allocation2]  }
   0xb   :  { %21 = dma.vmem_to_smem %s19_s23, 16, %s686_s25, [#allocation3]  }
   0xc   :  { %684 = dma.done.wait [#allocation3], 16  }
   0xd   :  { %685 = vsyncadd [#allocation3], 4294967280 }
   0xe   :  { %35 = sfence }
   0xf   :  { %v729_v0 = vld [vmem:[%s883_s2 + $0x78] sm:$0xff]   ;;  %v740_v2 = vld [vmem:[%s883_s2 + $0x70] sm:$0xff]   ;;  %v758_v6 = vld [vmem:[%s883_s2 + $0x68] sm:$0xff]   ;;  %v110_v28 = vlaneseq  ;;  %v687_v31 = vmov 1966171168   ;;  %vm483_vm0 = vcmask 58368  }
  0x10   :  { %v734_v1 = vld [vmem:[%s883_s2 + $0x38] sm:$0xff]   ;;  %566 = vmatprep.subr.bf16.mxu0 %v729_v0  ;;  %v750_v4 = vld [vmem:[%s883_s2 + $0x30] sm:$0xff]   ;;  %v768_v8 = vld [vmem:[%s883_s2 + $0x28] sm:$0xff]   ;;  %v108_v32 = vunpack.c.l.s4 %v687_v31  ;;  %s37_s16 = sld [smem:[#allocation2]]  ;;  %vm524_vm1 = vcmask 1024  }
  0x11   :  { %567 = vmatpush3.bf16.msra.mxu0 %v734_v1  ;;  %v637_v3 = vld [vmem:[%s884_s3 + $0x78] sm:$0xff]   ;;  %v641_v7 = vld [vmem:[%s884_s3 + $0x70] sm:$0xff]   ;;  %v776_v10 = vld [vmem:[%s883_s2 + $0x60] sm:$0xff]   ;;  %v111_v33 = vshrl.u32 %v110_v28, 7 }
  0x12   :  { %568 = vmatprep.subr.bf16.mxu0 %v740_v2  ;;  %588 = vmatprep.subr.bf16.mxu1 %v637_v3  ;;  %v639_v5 = vld [vmem:[%s884_s3 + $0x38] sm:$0xff]   ;;  %v643_v9 = vld [vmem:[%s884_s3 + $0x30] sm:$0xff]   ;;  %v645_v11 = vld [vmem:[%s884_s3 + $0x68] sm:$0xff]   ;;  %v109_v37 = vunpack.c.0.s8 %v108_v32 }
  0x13   :  { %589 = vmatpush3.bf16.msra.mxu1 %v639_v5  ;;  %v786_v12 = vld [vmem:[%s883_s2 + $0x20] sm:$0xff]   ;;  %v647_v13 = vld [vmem:[%s884_s3 + $0x28] sm:$0xff]   ;;  %v794_v14 = vld [vmem:[%s883_s2 + $0x58] sm:$0xff]  }
  0x14   :  { %590 = vmatprep.subr.bf16.mxu1 %v641_v7  ;;  %v649_v15 = vld [vmem:[%s884_s3 + $0x60] sm:$0xff]   ;;  %v650_v16 = vld [vmem:[%s883_s2 + $0x18] sm:$0xff]   ;;  %v652_v18 = vld [vmem:[%s883_s2 + $0x50] sm:$0xff]   ;;  %v112_v39 = vsub.s32 %v109_v37, %v111_v33 }
  0x15   :  { %569 = vmatpush3.bf16.msra.mxu0 %v750_v4  ;;  %v651_v17 = vld [vmem:[%s884_s3 + $0x20] sm:$0xff]   ;;  %v653_v19 = vld [vmem:[%s884_s3 + $0x58] sm:$0xff]   ;;  %v654_v20 = vld [vmem:[%s883_s2 + $0x10] sm:$0xff]  }
  0x16   :  { %570 = vmatprep.subr.bf16.mxu0 %v758_v6  ;;  %v655_v21 = vld [vmem:[%s884_s3 + $0x18] sm:$0xff]   ;;  %v656_v22 = vld [vmem:[%s883_s2 + $0x48] sm:$0xff]   ;;  %v657_v23 = vld [vmem:[%s884_s3 + $0x50] sm:$0xff]  }
  0x17   :  { %591 = vmatpush3.bf16.msra.mxu1 %v643_v9  ;;  %v658_v24 = vld [vmem:[%s883_s2 + $0x8] sm:$0xff]   ;;  %v659_v25 = vld [vmem:[%s884_s3 + $0x10] sm:$0xff]   ;;  %v660_v26 = vld [vmem:[%s883_s2 + $0x40] sm:$0xff]  }
  0x18   :  { %592 = vmatprep.subr.bf16.mxu1 %v645_v11  ;;  %v661_v27 = vld [vmem:[%s884_s3 + $0x48] sm:$0xff]   ;;  %v662_v29 = vld [vmem:[%s883_s2] sm:$0xff]  }
  0x19   :  { %571 = vmatpush3.bf16.msra.mxu0 %v768_v8  ;;  %v663_v30 = vld [vmem:[%s884_s3 + $0x8] sm:$0xff]   ;;  %v664_v34 = vld [vmem:[%s884_s3 + $0x40] sm:$0xff]  }
  0x1a   :  { %572 = vmatprep.subr.bf16.mxu0 %v776_v10  ;;  %v39_v35 = vld [vmem:[%s882_s1] sm:$0x3] }
  0x1b   :  { %593 = vmatpush3.bf16.msra.mxu1 %v647_v13  ;;  %v665_v36 = vld [vmem:[%s884_s3] sm:$0xff]   ;;  %v403_v38 = vmul.bf16 %v39_v35, %v39_v35  ;;  %v113_v40 = vrot.slane %v39_v35, %v112_v39 }
  0x1c   :  { %594 = vmatprep.subr.bf16.mxu1 %v649_v15  ;;  %v104_v48 = vld [vmem:[%s885_s4] sm:$0x1]  ;;  %s531_s4 = sld [smem:[#allocation2 + $0x1]] }
  0x1d   :  { %573 = vmatpush3.bf16.msra.mxu0 %v786_v12  ;;  %v411_v41 = vrot.slane %v403_v38, %v112_v39  ;;  %v114_v42 = vcombine.high %v113_v40, %v113_v40  ;;  %v121_v44 = vrot.slane %v113_v40, %v112_v39  ;;  %v105_v49 = vunpack.c.l.bf16 %v104_v48 }
  0x1e   :  { %574 = vmatprep.subr.bf16.mxu0 %v794_v14 }
  0x1f   :  { %595 = vmatpush3.bf16.msra.mxu1 %v651_v17  ;;  %v412_v43 = vcombine.high %v411_v41, %v411_v41  ;;  %v128_v45 = vrot.slane %v114_v42, %v112_v39  ;;  %v419_v47 = vrot.slane %v411_v41, %v112_v39  ;;  %v484_v50 = vsel %vm483_vm0, %v105_v49, 0.0 }
  0x20   :  { %596 = vmatprep.subr.bf16.mxu1 %v653_v19  ;;  %485 = vadd.xlane.f32.xlu0 %v484_v50 }
  0x21   :  { %575 = vmatpush3.bf16.msra.mxu0 %v650_v16  ;;  %v426_v46 = vrot.slane %v412_v43, %v112_v39  ;;  %259 = vmatprep.mubr.bf16.mxu0 %v128_v45 }
  0x22   :  { %576 = vmatprep.subr.bf16.mxu0 %v652_v18  ;;  %395 = vmatprep.mubr.bf16.mxu1 %v128_v45  ;;  %v476_v7 = vstv %s531_s4 }
  0x23   :  { %597 = vmatpush3.bf16.msra.mxu1 %v655_v21 }
  0x24   :  { %598 = vmatprep.subr.bf16.mxu1 %v657_v23  ;;  %v565_v23 = vld [vmem:[%s886_s5 + $0x4] sm:$0x3] }
  0x25   :  { %577 = vmatpush3.bf16.msra.mxu0 %v654_v20 }
  0x26   :  { %578 = vmatprep.subr.bf16.mxu0 %v656_v22 }
  0x27   :  { %599 = vmatpush3.bf16.msra.mxu1 %v659_v25 }
  0x28   :  { %600 = vmatprep.subr.bf16.mxu1 %v661_v27 }
  0x29   :  { %579 = vmatpush3.bf16.msra.mxu0 %v658_v24 }
  0x2a   :  { %580 = vmatprep.subr.bf16.mxu0 %v660_v26 }
  0x2b   :  { %601 = vmatpush3.bf16.msra.mxu1 %v663_v30 }
  0x2c   :  { %602 = vmatprep.subr.bf16.mxu1 %v664_v34 }
  0x2d   :  { %581 = vmatpush3.bf16.msra.mxu0 %v662_v29 }
  0x2e   :  { %610 = vmatprep.subr.bf16.mxu0 %v729_v0 }
  0x2f   :  { %603 = vmatpush3.bf16.msra.mxu1 %v665_v36 }
  0x30   :  { %260 = vmatmul.mubr.bf16.vlgmr.msra.gmra.mxu0 %v121_v44 }
  0x31   :  { %611 = vmatpush3.bf16.msra.mxu0 %v734_v1  ;;  %461 = vmatprep.mubr.bf16.mxu0 %v426_v46 }
  0x32   :  { %396 = vmatmul.mubr.bf16.vlgmr.msra.gmra.mxu1 %v121_v44  ;;  %612 = vmatprep.subr.bf16.mxu0 %v740_v2 }
  0x35   :  { %613 = vmatpush3.bf16.msra.mxu0 %v750_v4 }
  0x36   :  { %614 = vmatprep.subr.bf16.mxu0 %v758_v6 }
  0x39   :  { %615 = vmatpush3.bf16.msra.mxu0 %v768_v8 }
  0x3a   :  { %616 = vmatprep.subr.bf16.mxu0 %v776_v10 }
  0x3d   :  { %617 = vmatpush3.bf16.msra.mxu0 %v786_v12  ;;  %v480_v12 = vstv %s37_s16 }
  0x3e   :  { %618 = vmatprep.subr.bf16.mxu0 %v794_v14 }
  0x41   :  { %619 = vmatpush3.bf16.msra.mxu0 %v650_v16 }
  0x42   :  { %620 = vmatprep.subr.bf16.mxu0 %v652_v18 }
  0x45   :  { %621 = vmatpush3.bf16.msra.mxu0 %v654_v20 }
  0x46   :  { %622 = vmatprep.subr.bf16.mxu0 %v656_v22 }
  0x49   :  { %623 = vmatpush3.bf16.msra.mxu0 %v658_v24  ;;  %v495_v24 = vld [vmem:[%s886_s5] sm:$0x3] }
  0x4a   :  { %624 = vmatprep.subr.bf16.mxu0 %v660_v26  ;;  %v564_v26 = vld [vmem:[%s886_s5 + $0x2] sm:$0x3] }
  0x4d   :  { %625 = vmatpush3.bf16.msra.mxu0 %v662_v29 }
  0x50   :  { %462 = vmatmul.mubr.bf16.vlgmr.msra.gmra.mxu0 %v419_v47 }
  0xa9   :  { %v486_v17 = vpop.xlane.xlu0 %485 }
  0xaa   :  { %v490_v18 = vmax.f32 %v486_v17, 1.0 }
  0xf0   :  { %v582_v51 = vpop.f32.mrf.mxu0 }
  0xf2   :  { %v604_v52 = vpop.f32.mrf.mxu1  ;;  %v583_v53 = vpop.f32.mrf.mxu0 }
  0xf3   :  { %v584_v59 = vadd.f32 %v583_v53, %v582_v51 }
  0xf4   :  { %v605_v54 = vpop.f32.mrf.mxu1  ;;  %v585_v55 = vpop.f32.mrf.mxu0 }
  0xf5   :  { %v469_v61 = vmul.f32 0.03125, %v584_v59  ;;  %v606_v9 = vadd.f32 %v605_v54, %v604_v52 }
  0xf6   :  { %v607_v56 = vpop.f32.mrf.mxu1  ;;  %v586_v57 = vpop.f32.mrf.mxu0 }
  0xf7   :  { %v471_v1 = vmul.f32 %v469_v61, %v469_v61  ;;  %v477_v8 = vmul.f32 %v476_v7, %v469_v61 }
  0xf8   :  { %v608_v58 = vpop.f32.mrf.mxu1 }
  0xf9   :  { %v478_v10 = vsub.f32 %v606_v9, %v477_v8 }
 0x110   :  { %v626_v60 = vpop.f32.mrf.mxu0 }
 0x112   :  { %v627_v62 = vpop.f32.mrf.mxu0 }
 0x113   :  { %v628_v63 = vadd.f32 %v627_v62, %v626_v60 }
 0x114   :  { %v629_v0 = vpop.f32.mrf.mxu0 }
 0x115   :  { %v470_v2 = vmul.f32 0.03125, %v628_v63 }
 0x116   :  { %v630_v3 = vpop.f32.mrf.mxu0 }
 0x117   :  { %v472_v4 = vsub.f32 %v470_v2, %v471_v1 }
 0x119   :  { %v473_v5 = vmax.f32 %v472_v4, 0.0 }
 0x11b   :  { %v474_v6 = vadd.f32 1e-05, %v473_v5 }
 0x11d   :  { %666 = vrsqrt.f32 %v474_v6 }
 0x11e   :  { %668 = vrcp.f32 %v490_v18 }
 0x12a   :  { %v667_v11 = vpop.eup %666 }
 0x12b   :  { %v479_v13 = vmul.f32 %v667_v11, %v478_v10  ;;  %v669_v19 = vpop.eup %668 }
 0x12d   :  { %v481_v14 = vadd.f32 %v480_v12, %v479_v13 }
 0x12f   :  { %v482_v15 = vmul.f32 %v481_v14, %v105_v49 }
 0x131   :  { %v487_v16 = vsel %vm483_vm0, %v482_v15, 0.0 }
 0x132   :  { %488 = vadd.xlane.f32.xlu0 %v487_v16 }
 0x1bb   :  { %v489_v20 = vpop.xlane.xlu0 %488 }
 0x1bc   :  { %v492_v21 = vmul.f32 %v669_v19, %v489_v20 }
 0x1be   :  { %v493_v22 = vsub.f32 %v482_v15, %v492_v21 }
 0x1c0   :  { %v494_v25 = vmul.f32 %v493_v22, %v105_v49 }
 0x1c2   :  { %v508_v27 = vmul.f32 %v565_v23, %v494_v25  ;;  %v496_v28 = vmul.f32 %v495_v24, %v494_v25  ;;  %v502_v31 = vmul.f32 %v564_v26, %v494_v25 }
 0x1c4   :  { %v509_v29 = vsel %vm483_vm0, %v508_v27, 0.0  ;;  %v497_v30 = vsel %vm483_vm0, %v496_v28, 0.0  ;;  %v503_v32 = vsel %vm483_vm0, %v502_v31, 0.0 }
 0x1c5   :  { %510 = vadd.xlane.f32.xlu0 %v509_v29  ;;  %498 = vadd.xlane.f32.xlu1 %v497_v30 }
 0x1c9   :  { %504 = vadd.xlane.f32.xlu1 %v503_v32 }
 0x24e   :  { %v499_v33 = vpop.xlane.xlu1 %498  ;;  %v511_v34 = vpop.xlane.xlu0 %510 }
 0x24f   :  { %v512_v36 = vmul.f32 %v499_v33, %v499_v33  ;;  %v515_v38 = vmul.f32 %v511_v34, %v511_v34 }
 0x252   :  { %v505_v35 = vpop.xlane.xlu1 %504 }
 0x253   :  { %v513_v37 = vmul.f32 %v505_v35, %v505_v35 }
 0x255   :  { %v514_v39 = vadd.f32 %v513_v37, %v512_v36 }
 0x257   :  { %v516_v40 = vadd.f32 %v515_v38, %v514_v39 }
 0x259   :  { %670 = vrsqrt.f32 %v516_v40  ;;  %vm519_vm2 = vcmp.eq.f32.partialorder %v516_v40, inf  ;;  %v522_v43 = vand.u32 2147483648, %v516_v40  ;;  %vm521_vm3 = vcmp.eq.f32.partialorder %v516_v40, 0.0 }
 0x266   :  { %v671_v41 = vpop.eup %670 }
 0x267   :  { %v518_v42 = vmul.f32 %v671_v41, %v516_v40 }
 0x269   :  { %v520_v44 = vsel %vm519_vm2, %v516_v40, %v518_v42 }
 0x26a   :  { %v523_v45 = vsel %vm521_vm3, %v522_v43, %v520_v44 }
 0x26b   :  { %525 = vst.msk [vmem:[%s887_s6] sm:$0x3] %vm524_vm1, %v523_v45 }
 0x26c   :  { %530 = vsyncpa [#allocation3], 1 }

</bundles_post_ra>
